<compile_context>
chip_gen: v6e
topology: v6e:2x2x1
jax: 0.10.0
libtpu: 0.0.40
codegen_flags: <defaults>
</compile_context>

<pallas_src>
import jax
import jax.numpy as jnp
from jax.experimental import pallas as pl
from jax.experimental.pallas import tpu as pltpu

HIDDEN0 = 128
HIDDEN1 = 64
LANE = 128  # hidden-1 and the action dim are zero-padded to a full lane tile


def qnet_kernel(x_ref, w0_ref, b0_ref, w1_ref, b1_ref, w2_ref, b2_ref, o_ref):
    # x arrives in f32; cast to bf16 in-kernel (cheap VPU op hidden under MXU work).
    xb = x_ref[...].astype(jnp.bfloat16)
    # Layer 0: (TB, S)bf16 @ (S, 128)bf16 -> f32 acc, + bias, tanh (f32).
    h0 = jnp.tanh(
        jnp.dot(xb, w0_ref[...], preferred_element_type=jnp.float32) + b0_ref[...]
    )
    # Layer 1: (TB, 128)bf16 @ (128, 128)bf16 -> f32 acc, + bias, tanh (f32).
    h1 = jnp.tanh(
        jnp.dot(h0.astype(jnp.bfloat16), w1_ref[...],
                preferred_element_type=jnp.float32) + b1_ref[...]
    )
    # Layer 2: (TB, 128)bf16 @ (128, 128)bf16 -> f32 acc, + bias.
    # Lane-dense (TB, 128) store: every vst is a full, unmasked store.
    o_ref[...] = (
        jnp.dot(h1.astype(jnp.bfloat16), w2_ref[...],
                preferred_element_type=jnp.float32) + b2_ref[...]
    ).astype(o_ref.dtype)


def _round_up(n, m):
    return ((n + m - 1) // m) * m


def pack_qnet_params(params):
    """One-time parameter prep (call outside the training/inference loop).

    Returns ((w0b, b0, w1b, b1p, w2b, b2p), action_cnt) with bf16 MXU weights,
    hidden-1 and action lanes zero-padded to 128, biases kept in f32.
    """
    w0, b0, w1, b1, w2, b2 = params
    H1 = w1.shape[1]
    A = w2.shape[1]
    w0b = w0.astype(jnp.bfloat16)
    w1b = jnp.pad(w1, ((0, 0), (0, LANE - H1))).astype(jnp.bfloat16)
    b1p = jnp.pad(b1, ((0, 0), (0, LANE - H1)))                       # f32
    w2b = jnp.pad(w2, ((0, LANE - H1), (0, LANE - A))).astype(jnp.bfloat16)
    b2p = jnp.pad(b2, ((0, 0), (0, LANE - A)))                        # f32
    return (w0b, b0, w1b, b1p, w2b, b2p), A


def _choose_tile_b(B, max_tile_b=4096, prefer_tiles=2):
    # Aim for `prefer_tiles` grid steps so the "parallel" batch axis is split
    # across both v7x TensorCores (costs ~0.35us extra on 1-TC v5e/v6e), but
    # cap the tile so the double-buffered padded f32 output
    # (tile_b * 128 * 4 B per buffer) stays well inside scoped VMEM defaults.
    tb = _round_up(pl.cdiv(B, prefer_tiles), 128)
    return max(128, min(max_tile_b, tb))


def qnet_forward(x, packed_params, action_cnt, tile_b=None):
    """Fused QNet forward. x: (B, S) f32. Returns (B, action_cnt) f32."""
    w0b, b0, w1b, b1p, w2b, b2p = packed_params
    B, S = x.shape

    if tile_b is None:
        tile_b = _choose_tile_b(B)
    tile_b = min(tile_b, _round_up(B, 128))
    num_tiles = pl.cdiv(B, tile_b)
    B_pad = num_tiles * tile_b
    if B_pad != B:
        x = jnp.pad(x, ((0, B_pad - B), (0, 0)))

    const = lambda shape: pl.BlockSpec(shape, lambda i: (0, 0))

    out = pl.pallas_call(
        qnet_kernel,
        out_shape=jax.ShapeDtypeStruct((B_pad, LANE), jnp.float32),
        grid=(num_tiles,),
        in_specs=[
            pl.BlockSpec((tile_b, S), lambda i: (i, 0)),   # x: tiled over batch
            const(w0b.shape), const(b0.shape),             # params: VMEM-resident
            const(w1b.shape), const(b1p.shape),
            const(w2b.shape), const(b2p.shape),
        ],
        out_specs=pl.BlockSpec((tile_b, LANE), lambda i: (i, 0)),
        compiler_params=pltpu.CompilerParams(
            dimension_semantics=("parallel",)),            # megacore on v7x
    )(x, w0b, b0, w1b, b1p, w2b, b2p)

    return out[:B, :action_cnt]


def init_qnet_params(key, state_dim, action_cnt):
    # Deterministic init mimicking nn.Linear's U(-1/sqrt(fan_in), 1/sqrt(fan_in)).
    # Weights stored as (in_features, out_features); biases as (1, out_features).
    dims = [(state_dim, HIDDEN0), (HIDDEN0, HIDDEN1), (HIDDEN1, action_cnt)]
    params = []
    for (fan_in, fan_out) in dims:
        key, kw, kb = jax.random.split(key, 3)
        bound = 1.0 / jnp.sqrt(fan_in)
        w = jax.random.uniform(kw, (fan_in, fan_out), jnp.float32, -bound, bound)
        b = jax.random.uniform(kb, (1, fan_out), jnp.float32, -bound, bound)
        params += [w, b]
    return tuple(params)


if __name__ == "__main__":
    key = jax.random.PRNGKey(0)
    batch = 256        # batch of states (amortizes launch/DMA cost)
    state_dim = 4      # e.g. CartPole-like state vector
    action_cnt = 2     # number of discrete actions

    key, kx = jax.random.split(key)
    x = jax.random.normal(kx, (batch, state_dim), jnp.float32)
    params = init_qnet_params(key, state_dim, action_cnt)

    # Pack params once (outside the per-call path).
    packed, A = pack_qnet_params(params)

    # Auto tile_b -> 128 here => 2 grid steps, exercising the pipelined,
    # batch-parallel grid.
    out = qnet_forward(x, packed, A)
    jax.block_until_ready(out)
    assert out.shape == (batch, action_cnt)

    w0, b0, w1, b1, w2, b2 = params

    # Reference 1: same bf16-input / f32-accumulate recipe (tight tolerance).
    xb = x.astype(jnp.bfloat16)
    ref_bf16 = jnp.tanh(jnp.dot(xb, w0.astype(jnp.bfloat16),
                                preferred_element_type=jnp.float32) + b0)
    ref_bf16 = jnp.tanh(jnp.dot(ref_bf16.astype(jnp.bfloat16),
                                w1.astype(jnp.bfloat16),
                                preferred_element_type=jnp.float32) + b1)
    ref_bf16 = jnp.dot(ref_bf16.astype(jnp.bfloat16), w2.astype(jnp.bfloat16),
                       preferred_element_type=jnp.float32) + b2
    assert jnp.allclose(out, ref_bf16, atol=2e-3, rtol=2e-3)

    # Reference 2: full f32 torch-QNet parity (loose tolerance for bf16 MXU inputs).
    ref_f32 = jnp.tanh(x @ w0 + b0)
    ref_f32 = jnp.tanh(ref_f32 @ w1 + b1)
    ref_f32 = ref_f32 @ w2 + b2
    assert jnp.allclose(out, ref_f32, atol=3e-2, rtol=3e-2)

    print("KERNEL_OK")
</pallas_src>

<mosaic_0001>
module attributes {stable_mosaic.version = 11 : i64} {
  func.func @qnet_kernel(%arg0: i32, %arg1: memref<128x4xf32, #tpu.memory_space<vmem>>, %arg2: memref<4x128xbf16, #tpu.memory_space<vmem>>, %arg3: memref<1x128xf32, #tpu.memory_space<vmem>>, %arg4: memref<128x128xbf16, #tpu.memory_space<vmem>>, %arg5: memref<1x128xf32, #tpu.memory_space<vmem>>, %arg6: memref<128x128xbf16, #tpu.memory_space<vmem>>, %arg7: memref<1x128xf32, #tpu.memory_space<vmem>>, %arg8: memref<128x128xf32, #tpu.memory_space<vmem>>) attributes {dimension_semantics = [#tpu.dimension_semantics<parallel>], iteration_bounds = array<i64: 2>, scalar_prefetch = 0 : i64, scratch_operands = 0 : i64, tpu.core_type = #tpu.core_type<tc>, window_params = [{transform_indices = @transform_0, window_bounds = array<i64: 128, 4>}, {pipeline_mode = #tpu.pipeline_mode<synchronous>, transform_indices = @transform_1, window_bounds = array<i64: 4, 128>}, {pipeline_mode = #tpu.pipeline_mode<synchronous>, transform_indices = @transform_2, window_bounds = array<i64: 1, 128>}, {pipeline_mode = #tpu.pipeline_mode<synchronous>, transform_indices = @transform_3, window_bounds = array<i64: 128, 128>}, {pipeline_mode = #tpu.pipeline_mode<synchronous>, transform_indices = @transform_4, window_bounds = array<i64: 1, 128>}, {pipeline_mode = #tpu.pipeline_mode<synchronous>, transform_indices = @transform_5, window_bounds = array<i64: 128, 128>}, {pipeline_mode = #tpu.pipeline_mode<synchronous>, transform_indices = @transform_6, window_bounds = array<i64: 1, 128>}, {transform_indices = @transform_7, window_bounds = array<i64: 128, 128>}]} {
    %c0 = arith.constant 0 : index
    %c0_0 = arith.constant 0 : index
    %0 = vector.load %arg1[%c0, %c0_0] : memref<128x4xf32, #tpu.memory_space<vmem>>, vector<128x4xf32>
    %1 = arith.truncf %0 : vector<128x4xf32> to vector<128x4xbf16>
    %c0_1 = arith.constant 0 : index
    %c0_2 = arith.constant 0 : index
    %2 = vector.load %arg2[%c0_1, %c0_2] : memref<4x128xbf16, #tpu.memory_space<vmem>>, vector<4x128xbf16>
    %cst = arith.constant dense<0.000000e+00> : vector<128x128xf32>
    %3 = tpu.matmul %1, %2, %cst {dimension_numbers = #tpu.dot_dimension_numbers<[1], [0], [0], [1], [0, 0, 1, 1], [], []>} : vector<128x4xbf16>, vector<4x128xbf16>, vector<128x128xf32> -> vector<128x128xf32>
    %c0_3 = arith.constant 0 : index
    %c0_4 = arith.constant 0 : index
    %4 = vector.load %arg3[%c0_3, %c0_4] : memref<1x128xf32, #tpu.memory_space<vmem>>, vector<1x128xf32>
    %5 = vector.broadcast %4 : vector<1x128xf32> to vector<128x128xf32>
    %6 = arith.addf %3, %5 : vector<128x128xf32>
    %7 = math.tanh %6 : vector<128x128xf32>
    %8 = arith.truncf %7 : vector<128x128xf32> to vector<128x128xbf16>
    %c0_5 = arith.constant 0 : index
    %c0_6 = arith.constant 0 : index
    %9 = vector.load %arg4[%c0_5, %c0_6] : memref<128x128xbf16, #tpu.memory_space<vmem>>, vector<128x128xbf16>
    %cst_7 = arith.constant dense<0.000000e+00> : vector<128x128xf32>
    %10 = tpu.matmul %8, %9, %cst_7 {dimension_numbers = #tpu.dot_dimension_numbers<[1], [0], [0], [1], [0, 0, 1, 1], [], []>} : vector<128x128xbf16>, vector<128x128xbf16>, vector<128x128xf32> -> vector<128x128xf32>
    %c0_8 = arith.constant 0 : index
    %c0_9 = arith.constant 0 : index
    %11 = vector.load %arg5[%c0_8, %c0_9] : memref<1x128xf32, #tpu.memory_space<vmem>>, vector<1x128xf32>
    %12 = vector.broadcast %11 : vector<1x128xf32> to vector<128x128xf32>
    %13 = arith.addf %10, %12 : vector<128x128xf32>
    %14 = math.tanh %13 : vector<128x128xf32>
    %15 = arith.truncf %14 : vector<128x128xf32> to vector<128x128xbf16>
    %c0_10 = arith.constant 0 : index
    %c0_11 = arith.constant 0 : index
    %16 = vector.load %arg6[%c0_10, %c0_11] : memref<128x128xbf16, #tpu.memory_space<vmem>>, vector<128x128xbf16>
    %cst_12 = arith.constant dense<0.000000e+00> : vector<128x128xf32>
    %17 = tpu.matmul %15, %16, %cst_12 {dimension_numbers = #tpu.dot_dimension_numbers<[1], [0], [0], [1], [0, 0, 1, 1], [], []>} : vector<128x128xbf16>, vector<128x128xbf16>, vector<128x128xf32> -> vector<128x128xf32>
    %c0_13 = arith.constant 0 : index
    %c0_14 = arith.constant 0 : index
    %18 = vector.load %arg7[%c0_13, %c0_14] : memref<1x128xf32, #tpu.memory_space<vmem>>, vector<1x128xf32>
    %19 = vector.broadcast %18 : vector<1x128xf32> to vector<128x128xf32>
    %20 = arith.addf %17, %19 : vector<128x128xf32>
    %c0_15 = arith.constant 0 : index
    %c0_16 = arith.constant 0 : index
    %21 = vector.load %arg8[%c0_15, %c0_16] : memref<128x128xf32, #tpu.memory_space<vmem>>, vector<128x128xf32>
    tpu.vector_store %arg8[%c0_15, %c0_16], %20 {strides = array<i32>} : memref<128x128xf32, #tpu.memory_space<vmem>>, vector<128x128xf32>,
    return
  }
  func.func @transform_0(%arg0: i32) -> (i32, i32) {
    %c0_i32 = arith.constant 0 : i32
    %c0_i32_0 = arith.constant 0 : i32
    return %arg0, %c0_i32 : i32, i32
  }
  func.func @transform_1(%arg0: i32) -> (i32, i32) {
    %c0_i32 = arith.constant 0 : i32
    %c0_i32_0 = arith.constant 0 : i32
    %c0_i32_1 = arith.constant 0 : i32
    return %c0_i32, %c0_i32_0 : i32, i32
  }
  func.func @transform_2(%arg0: i32) -> (i32, i32) {
    %c0_i32 = arith.constant 0 : i32
    %c0_i32_0 = arith.constant 0 : i32
    %c0_i32_1 = arith.constant 0 : i32
    return %c0_i32, %c0_i32_0 : i32, i32
  }
  func.func @transform_3(%arg0: i32) -> (i32, i32) {
    %c0_i32 = arith.constant 0 : i32
    %c0_i32_0 = arith.constant 0 : i32
    %c0_i32_1 = arith.constant 0 : i32
    return %c0_i32, %c0_i32_0 : i32, i32
  }
  func.func @transform_4(%arg0: i32) -> (i32, i32) {
    %c0_i32 = arith.constant 0 : i32
    %c0_i32_0 = arith.constant 0 : i32
    %c0_i32_1 = arith.constant 0 : i32
    return %c0_i32, %c0_i32_0 : i32, i32
  }
  func.func @transform_5(%arg0: i32) -> (i32, i32) {
    %c0_i32 = arith.constant 0 : i32
    %c0_i32_0 = arith.constant 0 : i32
    %c0_i32_1 = arith.constant 0 : i32
    return %c0_i32, %c0_i32_0 : i32, i32
  }
  func.func @transform_6(%arg0: i32) -> (i32, i32) {
    %c0_i32 = arith.constant 0 : i32
    %c0_i32_0 = arith.constant 0 : i32
    %c0_i32_1 = arith.constant 0 : i32
    return %c0_i32, %c0_i32_0 : i32, i32
  }
  func.func @transform_7(%arg0: i32) -> (i32, i32) {
    %c0_i32 = arith.constant 0 : i32
    %c0_i32_0 = arith.constant 0 : i32
    return %arg0, %c0_i32 : i32, i32
  }
}

</mosaic_0001>

<bundles_post_ra>
// kernel: tpu_custom_call.1
= control target key start
LH: loop header
LB: loop body
LE: loop exit
PB: predicated region body
PF: predicated region fallthrough
CT: control target
= control target key end

     0   :  { %12 = vsyncpa [#allocation3], 0  ;;  %s1515_s0 = inlined_call_operand.vmem [shape: f32[256,4], index: 0, kind: input, shape index: {}]   ;;  %s1516_s1 = inlined_call_operand.vmem [shape: bf16[4,128], index: 1, kind: input, shape index: {}]   ;;  %s1517_s2 = inlined_call_operand.vmem [shape: f32[1,128], index: 2, kind: input, shape index: {}]   ;;  %s1518_s3 = inlined_call_operand.vmem [shape: bf16[128,128], index: 3, kind: input, shape index: {}]   ;;  %s1519_s4 = inlined_call_operand.vmem [shape: f32[1,128], index: 4, kind: input, shape index: {}]   ;;  %s1520_s5 = inlined_call_operand.vmem [shape: bf16[128,128], index: 5, kind: input, shape index: {}]   ;;  %s1521_s6 = inlined_call_operand.vmem [shape: f32[1,128], index: 6, kind: input, shape index: {}]   ;;  %s1522_s7 = inlined_call_operand.hbm [shape: f32[256,128], index: 7, kind: output, shape index: {}]  }
   0x1   :  { %14 = vsyncpa [#allocation3 + $0x1], 0  ;;  %s1305_s24 = smov 0   ;;  %s1307_s25 = smov 0  }
   0x2   :  { %s1309_s26 = smov 0   ;;  %s1311_s27 = smov 0  }
   0x3 LB: > { %s1326_s28 = sadd.s32 4294967295, %s1260_s27   ;;  %s915_s29 = sadd.s32 4294967294, %s1260_s27   ;;  %s1260_s27 = sphi %s1311_s27, %s1528_s27   ;;  %s1256_s26 = sphi %s1309_s26, %s1527_s26   ;;  %s1252_s25 = sphi %s1307_s25, %s1526_s25   ;;  %s1248_s24 = sphi %s1305_s24, %s1525_s24  }
   0x4   : > { %s1330_s30 = sadd.s32 1, %s1260_s27   ;;  %s179_s8 = sadd.s32 1, %s1256_s26 }
   0x5   : > { %s176_s9 = ssub.s32 %s1260_s27, %s1330_s30  ;;  %p189_p0 = scmp.ne.s32.totalorder %s1256_s26, %s1252_s25 }
   0x6   : > { %p177_p1 = scmp.eq.s32.totalorder %s176_s9, 0  ;;  %p190_p2 = scmp.eq.s32.totalorder %s1326_s28, 1 }
   0x7   : > { %p195_p3 = scmp.ne.s32.totalorder %s1252_s25, %s1248_s24  ;;  %p196_p4 = scmp.eq.s32.totalorder %s915_s29, 1 }
   0x8   : > { %s1341_s10 = scalar_select %p177_p1, %s1256_s26, %s179_s8  }
   0x9   : > { %p1343_p5 = por %p190_p2, %p189_p0  ;;  %p1347_p6 = por %p196_p4, %p195_p3 }
   0xa   : > { %p918_p7 = scmp.ge.s32.totalorder %s1260_s27, 1  ;;  %p241_p8 = scmp.lt.s32.totalorder %s1260_s27, 3 }
   0xc   : > { %p242_p9 = pnand %p918_p7, %p241_p8 }
   0xd   : > { %s920_s15 = sshll.u32 (!%p242_p9), %s1326_s28, 4  ;;  %s270_s14 = sand.u32 (!%p242_p9), 1, %s1252_s25  }
   0xe   : > { %245 = sbr.rel (%p242_p9) target bundleno = 701 (0x2bd), region = 48  ;;  %p274_p10 = scmp.lt.s32.totalorder (!%p242_p9), %s920_s15, 31 }
   0xf   : > { %s954_s19 = sshll.u32 (!%p242_p9), %s1326_s28, 11  ;;  %s1475_s28 = scalar_lea.sflag (!%p242_p9), [#allocation3], %s270_s14 }
  0x10   : > { %s1262_s8 = smov (!%p242_p9), [#allocation2]  }
  0x11   : > { %s1204_s9 = sshll.u32 (!%p242_p9), %s1262_s8, 4  ;;  %s1205_s9 = int_to_ptr.vmem [resolvable:$false] %s1204_s9 }
  0x12   : > { %s1206_s13 = scalar_lea.vmem (!%p242_p9), %s1205_s9, 4096 }
  0x13   : > { %v305_v0 = vld [vmem:[%s1516_s1] sm:$0x3]  ;;  %vm338_vm0 = vcmask 1041408   ;;  %v1120_v1 = vld [vmem:[%s1518_s3 + $0x38] sm:$0xff]   ;;  %v1121_v3 = vld [vmem:[%s1518_s3 + $0x30] sm:$0xff]   ;;  %s1530_s15 = smov (!%p274_p10, %s920_s15), 31 }
  0x14   : > { %1078 = vmatprep.subr.msk.bf16.mxu0 %vm338_vm0, %v305_v0  ;;  %v340_v2 = vsel %vm338_vm0, %v305_v0, 0  ;;  %1014 = vmatprep.subr.bf16.mxu1 %v1120_v1  ;;  %s921_s20 = sshll.u32 %s1530_s15, 3  ;;  %vm313_vm1 = vcmask 31744   ;;  %v1122_v28 = vld [vmem:[%s1518_s3 + $0x28] sm:$0xff]   ;;  %v1123_v29 = vld [vmem:[%s1518_s3 + $0x20] sm:$0xff]   ;;  %v1124_v30 = vld [vmem:[%s1518_s3 + $0x18] sm:$0xff]  }
  0x15   : > { %997 = vmatpush3.bf16.msra.mxu0 %v340_v2  ;;  %1015 = vmatpush3.bf16.msra.mxu1 %v1120_v1  ;;  %s1366_s23 = scalar_lea.vmem %s1515_s0, %s921_s20  ;;  %v1125_v31 = vld [vmem:[%s1518_s3 + $0x10] sm:$0xff]   ;;  %v1126_v32 = vld [vmem:[%s1518_s3 + $0x8] sm:$0xff]   ;;  %v1127_v33 = vld [vmem:[%s1518_s3] sm:$0xff]   ;;  %s919_s15 = sshll.u32 %s270_s14, 7 }
  0x16   : > { %1016 = vmatprep.subr.bf16.mxu1 %v1121_v3  ;;  %v281_v4 = vld [vmem:[%s1366_s23] sm:$0xff]  ;;  %v282_v5 = vld [vmem:[%s1366_s23 + $0x8] sm:$0xff]  ;;  %v283_v6 = vld [vmem:[%s1366_s23 + $0x10] sm:$0xff]  ;;  %s1446_s18 = scalar_lea.vmem [#allocation2], %s919_s15 }
  0x17   : > { %v297_v7 = vpack.c.bf16 %v282_v5, %v281_v4  ;;  %v284_v8 = vld [vmem:[%s1366_s23 + $0x18] sm:$0xff]  ;;  %v285_v9 = vld [vmem:[%s1366_s23 + $0x20] sm:$0xff]  ;;  %v286_v10 = vld [vmem:[%s1366_s23 + $0x28] sm:$0xff]  ;;  %s853_s20 = sshll.u32 %s1446_s18, 4  ;;  %s1469_s20 = int_to_ptr.vmem [resolvable:$true] %s853_s20 }
  0x18   : > { %v298_v11 = vpack.c.bf16 %v284_v8, %v283_v6  ;;  %v299_v12 = vpack.c.bf16 %v286_v10, %v285_v9  ;;  %v287_v13 = vld [vmem:[%s1366_s23 + $0x30] sm:$0xff]  ;;  %v288_v14 = vld [vmem:[%s1366_s23 + $0x38] sm:$0xff]  ;;  %v289_v15 = vld [vmem:[%s1366_s23 + $0x40] sm:$0xff]  ;;  %s1200_s29 = scalar_lea.vmem %s1469_s20, 2048  ;;  %p1207_p0 = scmp.lt.s32.totalorder %s1469_s20, %s1205_s9 }
  0x19   : > { %1017 = vmatpush3.bf16.msra.mxu1 %v1121_v3  ;;  %998 = vmatprep.mubr.msk.bf16.mxu0 %vm313_vm1, %v297_v7  ;;  %v290_v16 = vld [vmem:[%s1366_s23 + $0x48] sm:$0xff]  ;;  %v300_v17 = vpack.c.bf16 %v288_v14, %v287_v13  ;;  %v291_v19 = vld [vmem:[%s1366_s23 + $0x50] sm:$0xff]  ;;  %v292_v20 = vld [vmem:[%s1366_s23 + $0x58] sm:$0xff]  ;;  %p1201_p11 = scmp.ne.s32.totalorder %s1469_s20, %s1200_s29  ;;  %p1208_p1 = scmp.lt.s32.totalorder %s1206_s13, %s1200_s29 }
  0x1a   : > { %999 = vmatmul.mubr.msk.bf16.vlgmr.msra.gmra.mxu0 %vm313_vm1, %v298_v11  ;;  %v301_v18 = vpack.c.bf16 %v290_v16, %v289_v15  ;;  %v293_v21 = vld [vmem:[%s1366_s23 + $0x60] sm:$0xff]  ;;  %v294_v22 = vld [vmem:[%s1366_s23 + $0x68] sm:$0xff]  ;;  %v302_v23 = vpack.c.bf16 %v292_v20, %v291_v19  ;;  %v295_v25 = vld [vmem:[%s1366_s23 + $0x70] sm:$0xff]  ;;  %1018 = vmatprep.subr.bf16.mxu1 %v1122_v28 }
  0x1b   : > { %1002 = vmatprep.mubr.msk.bf16.mxu0 %vm313_vm1, %v299_v12  ;;  %v303_v24 = vpack.c.bf16 %v294_v22, %v293_v21  ;;  %v296_v26 = vld [vmem:[%s1366_s23 + $0x78] sm:$0xff]  ;;  %v1129_v35 = vld [vmem:[%s1520_s5 + $0x30] sm:$0xff]   ;;  %v922_v37 = vld [vmem:[%s1517_s2] ss:$0 sm:$0xff]  ;;  %s1467_s23 = scalar_lea.hbm %s1522_s7, %s954_s19  ;;  %p1202_p12 = pnand %p1201_p11, %p1343_p5 }
  0x1c   : > { %v304_v27 = vpack.c.bf16 %v296_v26, %v295_v25  ;;  %v1128_v34 = vld [vmem:[%s1520_s5 + $0x38] sm:$0xff]   ;;  %p1209_p2 = por %p1208_p1, %p1207_p0 }
  0x1d   : > { %1019 = vmatpush3.bf16.msra.mxu1 %v1122_v28  ;;  %1046 = vmatprep.subr.bf16.mxu0 %v1128_v34  ;;  %p1203_p13 = pneg %p1202_p12 }
  0x1e   : > { %1020 = vmatprep.subr.bf16.mxu1 %v1123_v29  ;;  %1047 = vmatpush3.bf16.msra.mxu0 %v1128_v34  ;;  %v1135_v34 = vld [vmem:[%s1520_s5] sm:$0xff]  }
  0x1f   : > { %1048 = vmatprep.subr.bf16.mxu0 %v1129_v35  ;;  %p1210_p3 = pnand %p1209_p2, %p1203_p13 }
  0x21   : > { %1021 = vmatpush3.bf16.msra.mxu1 %v1123_v29  ;;  %v1130_v29 = vld [vmem:[%s1520_s5 + $0x28] sm:$0xff]  }
  0x22   : > { %1003 = vmatmul.mubr.msk.bf16.gmra.mxu0 %vm313_vm1, %v300_v17  ;;  %1022 = vmatprep.subr.bf16.mxu1 %v1124_v30 }
  0x23   : > { %1006 = vmatprep.mubr.msk.bf16.mxu0 %vm313_vm1, %v301_v18  ;;  %1049 = vmatpush3.bf16.msra.mxu0 %v1129_v35 }
  0x24   : > { %1050 = vmatprep.subr.bf16.mxu0 %v1130_v29 }
  0x25   : > { %1023 = vmatpush3.bf16.msra.mxu1 %v1124_v30  ;;  %v1131_v30 = vld [vmem:[%s1520_s5 + $0x20] sm:$0xff]  }
  0x26   : > { %1024 = vmatprep.subr.bf16.mxu1 %v1125_v31 }
  0x27   : > { %1051 = vmatpush3.bf16.msra.mxu0 %v1130_v29 }
  0x28   : > { %1052 = vmatprep.subr.bf16.mxu0 %v1131_v30 }
  0x29   : > { %1025 = vmatpush3.bf16.msra.mxu1 %v1125_v31  ;;  %v1132_v31 = vld [vmem:[%s1520_s5 + $0x18] sm:$0xff]  }
  0x2a   : > { %1007 = vmatmul.mubr.msk.bf16.gmra.mxu0 %vm313_vm1, %v302_v23  ;;  %1026 = vmatprep.subr.bf16.mxu1 %v1126_v32 }
  0x2b   : > { %1010 = vmatprep.mubr.msk.bf16.mxu0 %vm313_vm1, %v303_v24  ;;  %1053 = vmatpush3.bf16.msra.mxu0 %v1131_v30 }
  0x2c   : > { %1054 = vmatprep.subr.bf16.mxu0 %v1132_v31 }
  0x2d   : > { %1027 = vmatpush3.bf16.msra.mxu1 %v1126_v32  ;;  %v1133_v32 = vld [vmem:[%s1520_s5 + $0x10] sm:$0xff]  }
  0x2e   : > { %1028 = vmatprep.subr.bf16.mxu1 %v1127_v33 }
  0x2f   : > { %1055 = vmatpush3.bf16.msra.mxu0 %v1132_v31 }
  0x30   : > { %1056 = vmatprep.subr.bf16.mxu0 %v1133_v32 }
  0x31   : > { %1029 = vmatpush3.bf16.msra.mxu1 %v1127_v33  ;;  %v1134_v33 = vld [vmem:[%s1520_s5 + $0x8] sm:$0xff]  }
  0x32   : > { %1011 = vmatmul.mubr.msk.bf16.gmra.mxu0 %vm313_vm1, %v304_v27 }
  0x33   : > { %1057 = vmatpush3.bf16.msra.mxu0 %v1133_v32 }
  0x34   : > { %1058 = vmatprep.subr.bf16.mxu0 %v1134_v33 }
  0x37   : > { %1059 = vmatpush3.bf16.msra.mxu0 %v1134_v33 }
  0x38   : > { %1060 = vmatprep.subr.bf16.mxu0 %v1135_v34 }
  0x3b   : > { %1061 = vmatpush3.bf16.msra.mxu0 %v1135_v34 }
  0xda   : > { %v1000_v36 = vpop.f32.mrf.mxu0 }
  0xdb   : > { %v385_v42 = vadd.f32 %v1000_v36, %v922_v37  ;;  %v931_v36 = vld [vmem:[%s1519_s4] ss:$0 sm:$0xff] }
  0xdc   : > { %v376_v38 = vpop.f32.mrf.mxu0 }
  0xdd   : > { %v377_v39 = vadd.f32 %v922_v37, %v376_v38 }
  0xde   : > { %v1001_v40 = vpop.f32.mrf.mxu0 }
  0xdf   : > { %v388_v41 = vadd.f32 %v1001_v40, %v922_v37  ;;  %1136 = vtanh.f32 %v377_v39 }
  0xe0   : > { %v379_v43 = vpop.f32.mrf.mxu0 }
  0xe1   : > { %v380_v44 = vadd.f32 %v922_v37, %v379_v43  ;;  %1138 = vtanh.f32 %v388_v41 }
  0xe2   : > { %v1004_v45 = vpop.f32.mrf.mxu0 }
  0xe3   : > { %1140 = vtanh.f32 %v380_v44  ;;  %v401_v50 = vadd.f32 %v1004_v45, %v922_v37 }
  0xe4   : > { %1142 = vtanh.f32 %v385_v42  ;;  %v392_v46 = vpop.f32.mrf.mxu0 }
  0xe5   : > { %v393_v47 = vadd.f32 %v922_v37, %v392_v46 }
  0xe6   : > { %v1005_v48 = vpop.f32.mrf.mxu0 }
  0xe7   : > { %v404_v49 = vadd.f32 %v1005_v48, %v922_v37  ;;  %1144 = vtanh.f32 %v393_v47 }
  0xe8   : > { %v395_v51 = vpop.f32.mrf.mxu0 }
  0xe9   : > { %v396_v52 = vadd.f32 %v922_v37, %v395_v51  ;;  %1146 = vtanh.f32 %v404_v49 }
  0xea   : > { %v1008_v53 = vpop.f32.mrf.mxu0 }
  0xeb   : > { %1148 = vtanh.f32 %v396_v52  ;;  %v417_v61 = vadd.f32 %v1008_v53, %v922_v37 }
  0xec   : > { %1150 = vtanh.f32 %v401_v50  ;;  %v408_v54 = vpop.f32.mrf.mxu0  ;;  %v1137_v56 = vpop.eup %1136 }
  0xed   : > { %v409_v55 = vadd.f32 %v922_v37, %v408_v54 }
  0xee   : > { %v1009_v57 = vpop.f32.mrf.mxu0  ;;  %v1139_v58 = vpop.eup %1138 }
  0xef   : > { %v420_v59 = vadd.f32 %v1009_v57, %v922_v37  ;;  %1152 = vtanh.f32 %v409_v55 }
  0xf0   : > { %v1141_v60 = vpop.eup %1140  ;;  %v411_v62 = vpop.f32.mrf.mxu0 }
  0xf1   : > { %v1143_v63 = vpop.eup %1142  ;;  %v412_v0 = vadd.f32 %v922_v37, %v411_v62  ;;  %v455_v1 = vpack.c.bf16 %v1141_v60, %v1137_v56  ;;  %1154 = vtanh.f32 %v420_v59 }
  0xf2   : > { %v1012_v2 = vpop.f32.mrf.mxu0  ;;  %v456_v3 = vpack.c.bf16 %v1139_v58, %v1143_v63 }
  0xf3   : > { %1156 = vtanh.f32 %v412_v0  ;;  %1030 = vmatprep.mubr.bf16.mxu1 %v455_v1  ;;  %v433_v11 = vadd.f32 %v1012_v2, %v922_v37 }
  0xf4   : > { %1158 = vtanh.f32 %v417_v61  ;;  %v424_v4 = vpop.f32.mrf.mxu0  ;;  %1031 = vmatmul.mubr.bf16.vlgmr.msra.gmra.mxu1 %v456_v3  ;;  %v1145_v6 = vpop.eup %1144 }
  0xf5   : > { %v425_v5 = vadd.f32 %v922_v37, %v424_v4 }
  0xf6   : > { %v1013_v7 = vpop.f32.mrf.mxu0  ;;  %v1147_v8 = vpop.eup %1146 }
  0xf7   : > { %v436_v9 = vadd.f32 %v1013_v7, %v922_v37  ;;  %1160 = vtanh.f32 %v425_v5 }
  0xf8   : > { %v1149_v10 = vpop.eup %1148  ;;  %v427_v12 = vpop.f32.mrf.mxu0 }
  0xf9   : > { %v1151_v13 = vpop.eup %1150  ;;  %v428_v14 = vadd.f32 %v922_v37, %v427_v12  ;;  %v457_v15 = vpack.c.bf16 %v1149_v10, %v1145_v6  ;;  %1162 = vtanh.f32 %v436_v9 }
  0xfa   : > { %v458_v16 = vpack.c.bf16 %v1147_v8, %v1151_v13 }
  0xfb   : > { %1164 = vtanh.f32 %v428_v14  ;;  %1034 = vmatprep.mubr.bf16.mxu1 %v457_v15 }
  0xfc   : > { %1166 = vtanh.f32 %v433_v11  ;;  %1035 = vmatmul.mubr.bf16.gmra.mxu1 %v458_v16  ;;  %v1153_v17 = vpop.eup %1152 }
  0xfe   : > { %v1155_v18 = vpop.eup %1154 }
 0x100   : > { %v1157_v19 = vpop.eup %1156 }
 0x101   : > { %v1159_v20 = vpop.eup %1158  ;;  %v459_v21 = vpack.c.bf16 %v1157_v19, %v1153_v17 }
 0x102   : > { %v460_v22 = vpack.c.bf16 %v1155_v18, %v1159_v20 }
 0x103   : > { %1038 = vmatprep.mubr.bf16.mxu1 %v459_v21 }
 0x104   : > { %1039 = vmatmul.mubr.bf16.gmra.mxu1 %v460_v22  ;;  %v1161_v23 = vpop.eup %1160 }
 0x106   : > { %v1163_v24 = vpop.eup %1162 }
 0x108   : > { %v1165_v25 = vpop.eup %1164 }
 0x109   : > { %v1167_v26 = vpop.eup %1166  ;;  %v461_v27 = vpack.c.bf16 %v1165_v25, %v1161_v23 }
 0x10a   : > { %v462_v28 = vpack.c.bf16 %v1163_v24, %v1167_v26 }
 0x10b   : > { %1042 = vmatprep.mubr.bf16.mxu1 %v461_v27 }
 0x10c   : > { %1043 = vmatmul.mubr.bf16.gmra.mxu1 %v462_v28  ;;  %v940_v28 = vld [vmem:[%s1521_s6] ss:$0 sm:$0xff] }
 0x1b4   : > { %v1032_v35 = vpop.f32.mrf.mxu1 }
 0x1b5   : > { %v577_v41 = vadd.f32 %v1032_v35, %v931_v36 }
 0x1b6   : > { %v568_v37 = vpop.f32.mrf.mxu1 }
 0x1b7   : > { %v569_v38 = vadd.f32 %v931_v36, %v568_v37 }
 0x1b8   : > { %v1033_v39 = vpop.f32.mrf.mxu1 }
 0x1b9   : > { %v580_v40 = vadd.f32 %v1033_v39, %v931_v36  ;;  %1168 = vtanh.f32 %v569_v38 }
 0x1ba   : > { %v571_v42 = vpop.f32.mrf.mxu1 }
 0x1bb   : > { %v572_v43 = vadd.f32 %v931_v36, %v571_v42  ;;  %1170 = vtanh.f32 %v580_v40 }
 0x1bc   : > { %v1036_v44 = vpop.f32.mrf.mxu1 }
 0x1bd   : > { %1172 = vtanh.f32 %v572_v43  ;;  %v593_v49 = vadd.f32 %v1036_v44, %v931_v36 }
 0x1be   : > { %1174 = vtanh.f32 %v577_v41  ;;  %v584_v45 = vpop.f32.mrf.mxu1 }
 0x1bf   : > { %v585_v46 = vadd.f32 %v931_v36, %v584_v45 }
 0x1c0   : > { %v1037_v47 = vpop.f32.mrf.mxu1 }
 0x1c1   : > { %v596_v48 = vadd.f32 %v1037_v47, %v931_v36  ;;  %1176 = vtanh.f32 %v585_v46 }
 0x1c2   : > { %v587_v50 = vpop.f32.mrf.mxu1 }
 0x1c3   : > { %v588_v51 = vadd.f32 %v931_v36, %v587_v50  ;;  %1178 = vtanh.f32 %v596_v48 }
 0x1c4   : > { %v1040_v52 = vpop.f32.mrf.mxu1 }
 0x1c5   : > { %1180 = vtanh.f32 %v588_v51  ;;  %v609_v60 = vadd.f32 %v1040_v52, %v931_v36 }
 0x1c6   : > { %1182 = vtanh.f32 %v593_v49  ;;  %v600_v53 = vpop.f32.mrf.mxu1  ;;  %v1169_v55 = vpop.eup %1168 }
 0x1c7   : > { %v601_v54 = vadd.f32 %v931_v36, %v600_v53 }
 0x1c8   : > { %v1041_v56 = vpop.f32.mrf.mxu1  ;;  %v1171_v57 = vpop.eup %1170 }
 0x1c9   : > { %v612_v58 = vadd.f32 %v1041_v56, %v931_v36  ;;  %1184 = vtanh.f32 %v601_v54 }
 0x1ca   : > { %v1173_v59 = vpop.eup %1172  ;;  %v603_v61 = vpop.f32.mrf.mxu1 }
 0x1cb   : > { %v1175_v62 = vpop.eup %1174  ;;  %v604_v63 = vadd.f32 %v931_v36, %v603_v61  ;;  %v647_v0 = vpack.c.bf16 %v1173_v59, %v1169_v55  ;;  %1186 = vtanh.f32 %v612_v58 }
 0x1cc   : > { %v1044_v1 = vpop.f32.mrf.mxu1  ;;  %v648_v2 = vpack.c.bf16 %v1171_v57, %v1175_v62 }
 0x1cd   : > { %1188 = vtanh.f32 %v604_v63  ;;  %1062 = vmatprep.mubr.bf16.mxu0 %v647_v0  ;;  %v625_v10 = vadd.f32 %v1044_v1, %v931_v36 }
 0x1ce   : > { %1190 = vtanh.f32 %v609_v60  ;;  %v616_v3 = vpop.f32.mrf.mxu1  ;;  %1063 = vmatmul.mubr.bf16.vlgmr.msra.gmra.mxu0 %v648_v2  ;;  %v1177_v5 = vpop.eup %1176 }
 0x1cf   : > { %v617_v4 = vadd.f32 %v931_v36, %v616_v3 }
 0x1d0   : > { %v1045_v6 = vpop.f32.mrf.mxu1  ;;  %v1179_v7 = vpop.eup %1178 }
 0x1d1   : > { %v628_v8 = vadd.f32 %v1045_v6, %v931_v36  ;;  %1192 = vtanh.f32 %v617_v4 }
 0x1d2   : > { %v1181_v9 = vpop.eup %1180  ;;  %v619_v11 = vpop.f32.mrf.mxu1 }
 0x1d3   : > { %v1183_v12 = vpop.eup %1182  ;;  %v620_v13 = vadd.f32 %v931_v36, %v619_v11  ;;  %v649_v14 = vpack.c.bf16 %v1181_v9, %v1177_v5  ;;  %1194 = vtanh.f32 %v628_v8 }
 0x1d4   : > { %v650_v15 = vpack.c.bf16 %v1179_v7, %v1183_v12 }
 0x1d5   : > { %1196 = vtanh.f32 %v620_v13  ;;  %1066 = vmatprep.mubr.bf16.mxu0 %v649_v14 }
 0x1d6   : > { %1198 = vtanh.f32 %v625_v10  ;;  %1067 = vmatmul.mubr.bf16.gmra.mxu0 %v650_v15  ;;  %v1185_v16 = vpop.eup %1184 }
 0x1d8   : > { %v1187_v17 = vpop.eup %1186 }
 0x1da   : > { %v1189_v18 = vpop.eup %1188 }
 0x1db   : > { %v1191_v19 = vpop.eup %1190  ;;  %v651_v20 = vpack.c.bf16 %v1189_v18, %v1185_v16 }
 0x1dc   : > { %v652_v21 = vpack.c.bf16 %v1187_v17, %v1191_v19 }
 0x1dd   : > { %1070 = vmatprep.mubr.bf16.mxu0 %v651_v20 }
 0x1de   : > { %1071 = vmatmul.mubr.bf16.gmra.mxu0 %v652_v21  ;;  %v1193_v22 = vpop.eup %1192 }
 0x1e0   : > { %v1195_v23 = vpop.eup %1194 }
 0x1e2   : > { %v1197_v24 = vpop.eup %1196 }
 0x1e3   : > { %v1199_v25 = vpop.eup %1198  ;;  %v653_v26 = vpack.c.bf16 %v1197_v24, %v1193_v22 }
 0x1e4   : > { %v654_v27 = vpack.c.bf16 %v1195_v23, %v1199_v25 }
 0x1e5   : > { %1074 = vmatprep.mubr.bf16.mxu0 %v653_v26 }
 0x1e6   : > { %1075 = vmatmul.mubr.bf16.gmra.mxu0 %v654_v27 }
 0x28e   : > { %v1064_v29 = vpop.f32.mrf.mxu0 }
 0x28f   : > { %v769_v30 = vadd.f32 %v1064_v29, %v940_v28 }
 0x290   : > { %v760_v31 = vpop.f32.mrf.mxu0 }
 0x291   : > { %825 = vst [vmem:[%s1446_s18 + $0x10] sm:$0xff] %v769_v30  ;;  %v761_v32 = vadd.f32 %v940_v28, %v760_v31 }
 0x292   : > { %v1065_v33 = vpop.f32.mrf.mxu0 }
 0x293   : > { %823 = vst [vmem:[%s1446_s18] sm:$0xff] %v761_v32  ;;  %v772_v34 = vadd.f32 %v1065_v33, %v940_v28 }
 0x294   : > { %v763_v35 = vpop.f32.mrf.mxu0 }
 0x295   : > { %826 = vst [vmem:[%s1446_s18 + $0x18] sm:$0xff] %v772_v34  ;;  %v764_v36 = vadd.f32 %v940_v28, %v763_v35 }
 0x296   : > { %v1068_v37 = vpop.f32.mrf.mxu0 }
 0x297   : > { %824 = vst [vmem:[%s1446_s18 + $0x8] sm:$0xff] %v764_v36  ;;  %v785_v38 = vadd.f32 %v1068_v37, %v940_v28 }
 0x298   : > { %v776_v39 = vpop.f32.mrf.mxu0 }
 0x299   : > { %829 = vst [vmem:[%s1446_s18 + $0x30] sm:$0xff] %v785_v38  ;;  %v777_v40 = vadd.f32 %v940_v28, %v776_v39 }
 0x29a   : > { %v1069_v41 = vpop.f32.mrf.mxu0 }
 0x29b   : > { %827 = vst [vmem:[%s1446_s18 + $0x20] sm:$0xff] %v777_v40  ;;  %v788_v42 = vadd.f32 %v1069_v41, %v940_v28 }
 0x29c   : > { %v779_v43 = vpop.f32.mrf.mxu0 }
 0x29d   : > { %830 = vst [vmem:[%s1446_s18 + $0x38] sm:$0xff] %v788_v42  ;;  %v780_v44 = vadd.f32 %v940_v28, %v779_v43 }
 0x29e   : > { %v1072_v45 = vpop.f32.mrf.mxu0 }
 0x29f   : > { %828 = vst [vmem:[%s1446_s18 + $0x28] sm:$0xff] %v780_v44  ;;  %v801_v46 = vadd.f32 %v1072_v45, %v940_v28 }
 0x2a0   : > { %v792_v47 = vpop.f32.mrf.mxu0 }
 0x2a1   : > { %833 = vst [vmem:[%s1446_s18 + $0x50] sm:$0xff] %v801_v46  ;;  %v793_v48 = vadd.f32 %v940_v28, %v792_v47 }
 0x2a2   : > { %v1073_v49 = vpop.f32.mrf.mxu0 }
 0x2a3   : > { %831 = vst [vmem:[%s1446_s18 + $0x40] sm:$0xff] %v793_v48  ;;  %v804_v50 = vadd.f32 %v1073_v49, %v940_v28 }
 0x2a4   : > { %v795_v51 = vpop.f32.mrf.mxu0 }
 0x2a5   : > { %834 = vst [vmem:[%s1446_s18 + $0x58] sm:$0xff] %v804_v50  ;;  %v796_v52 = vadd.f32 %v940_v28, %v795_v51 }
 0x2a6   : > { %v1076_v53 = vpop.f32.mrf.mxu0 }
 0x2a7   : > { %832 = vst [vmem:[%s1446_s18 + $0x48] sm:$0xff] %v796_v52  ;;  %v817_v54 = vadd.f32 %v1076_v53, %v940_v28 }
 0x2a8   : > { %v808_v55 = vpop.f32.mrf.mxu0 }
 0x2a9   : > { %837 = vst [vmem:[%s1446_s18 + $0x70] sm:$0xff] %v817_v54  ;;  %v809_v56 = vadd.f32 %v940_v28, %v808_v55 }
 0x2aa   : > { %v1077_v57 = vpop.f32.mrf.mxu0 }
 0x2ab   : > { %835 = vst [vmem:[%s1446_s18 + $0x60] sm:$0xff] %v809_v56  ;;  %v820_v58 = vadd.f32 %v1077_v57, %v940_v28 }
 0x2ac   : > { %v811_v59 = vpop.f32.mrf.mxu0 }
 0x2ad   : > { %838 = vst [vmem:[%s1446_s18 + $0x78] sm:$0xff] %v820_v58  ;;  %v812_v60 = vadd.f32 %v940_v28, %v811_v59 }
 0x2af   : > { %836 = vst [vmem:[%s1446_s18 + $0x68] sm:$0xff] %v812_v60 }
 0x2b0   : > { %1213 = shalt.err (!%p1210_p3)
}
 0x2b1   : > { %s1214_s14 = scalar_lea.hbm %s1467_s23, 2048  ;;  %s1218_s17 = scalar_lea.hbm %s1522_s7, 4096 }
 0x2b2   : > { %p1215_p4 = scmp.ne.s32.totalorder %s1467_s23, %s1214_s14  ;;  %p1219_p9 = scmp.lt.s32.totalorder %s1467_s23, %s1522_s7 }
 0x2b3   : > { %p1220_p10 = scmp.lt.s32.totalorder %s1218_s17, %s1214_s14 }
 0x2b4   : > { %p1216_p7 = pnand %p1215_p4, %p1343_p5 }
 0x2b5   : > { %p1221_p11 = por %p1220_p10, %p1219_p9 }
 0x2b6   : > { %p1217_p8 = pneg %p1216_p7 }
 0x2b8   : > { %p1222_p12 = pnand %p1221_p11, %p1217_p8 }
 0x2ba   : > { %1225 = shalt.err (!%p1222_p12)
}
 0x2bb   : > { %s1263_s21 = smov 128   ;;  %s1264_s22 = smov 8  }
 0x2bc   : > { %1079 = dma.vmem_to_hbm [thread:$0]  (%p1343_p5), %s1469_s20, 2048, %s1467_s23, %s1475_s28, %s1263_s21, %s1263_s21, %s1264_s22  }
 0x2bd PF: > { %p1085_p13 = scmp.ge.s32.totalorder %s1260_s27, 2  ;;  %s868_s29 = sand.u32 1, %s1248_s24  }
 0x2be   : > { %s869_s8 = scalar_lea.sflag [#allocation3], %s868_s29 }
 0x2bf   : > { %p1082_p0 = pnand %p1085_p13, %p1347_p6 }
 0x2c1   : > { %p1083_p1 = pneg %p1082_p0 }
 0x2c3   : > { %1243 = dma.done.wait (%p1083_p1), %s869_s8, 2048  }
 0x2c4   : > { %1245 = vsyncadd (%p1083_p1), %s869_s8, 4294965248  ;;  %p17_p2 = scmp.ge.s32.totalorder %s1330_s30, 4   ;;  %s1525_s24 = smov %s1252_s25 }
 0x2c5   : > { %s1526_s25 = smov %s1256_s26  ;;  %s1527_s26 = smov %s1341_s10 }
 0x2c6   : > { %s1528_s27 = smov %s1330_s30  ;;  %19 = sbr.rel (!%p17_p2) target bundleno = 3 (0x3), region = 83 }
 0x2cb   :  { %874 = vsyncpa [#allocation3], 1 }
 0x2cc   :  { %876 = vsyncpa [#allocation3 + $0x1], 1 }

</bundles_post_ra>
